<compile_context>
chip_gen: v6e
topology: v6e:2x2x1
jax: 0.10.0
libtpu: 0.0.40
codegen_flags: <defaults>
</compile_context>

<pallas_src>
import functools

import jax
import jax.numpy as jnp
from jax.experimental import pallas as pl
from jax.experimental.pallas import tpu as pltpu

EPS = 1e-6  # F.pairwise_distance default eps


def _round_up(x, m):
    return (x + m - 1) // m * m


def _triplet_kernel(x_ref, dp_ref, dn_ref, lsum_ref, *, d, tile_b, batch_size):
    # x_ref block: (tile_b, 3*d) -- one contiguous row per triplet [a | p | n].
    # Slice the Ref (not a materialized value) so Mosaic streams loads per consumer.
    a = x_ref[:, 0 * d:1 * d]
    p = x_ref[:, 1 * d:2 * d]
    n = x_ref[:, 2 * d:3 * d]

    diff_p = a - p + jnp.float32(EPS)
    diff_n = a - n + jnp.float32(EPS)

    # Row-wise sum of squares on the otherwise-idle MXU:
    #   (1, d) . (tile_b, d)^T -> (1, tile_b)
    # Result lands already lane-oriented, so dp/dn stores are unmasked lane-dense
    # (tile_b is a multiple of 128).
    ones_row = jnp.ones((1, d), dtype=jnp.float32)
    dims = (((1,), (1,)), ((), ()))
    dp_sq = jax.lax.dot_general(ones_row, diff_p * diff_p, dims,
                                precision=jax.lax.Precision.HIGHEST,
                                preferred_element_type=jnp.float32)
    dn_sq = jax.lax.dot_general(ones_row, diff_n * diff_n, dims,
                                precision=jax.lax.Precision.HIGHEST,
                                preferred_element_type=jnp.float32)
    dp = jnp.sqrt(dp_sq)                          # (1, tile_b)
    dn = jnp.sqrt(dn_sq)                          # (1, tile_b)

    dp_ref[...] = dp
    dn_ref[...] = dn

    # margin = (dp + dn)/2 (both non-negative) -> hinge = max(0, 1.5*dp - 0.5*dn).
    hinge = jnp.maximum(jnp.float32(0.0), 1.5 * dp - 0.5 * dn)
    if batch_size % tile_b != 0:
        # Trailing partial block: rows >= batch_size contain unspecified data.  Mask
        # them out of the loss sum (their dp/dn lanes are sliced off in the wrapper).
        i = pl.program_id(0)
        col = jax.lax.broadcasted_iota(jnp.int32, (1, tile_b), 1)
        hinge = jnp.where(i * tile_b + col < batch_size, hinge, jnp.float32(0.0))

    partial = jnp.sum(hinge, axis=-1, keepdims=True)           # (1, 1)
    lsum_ref[...] = jnp.broadcast_to(partial.reshape(1, 1, 1), (1, 1, 128))


def adaptative_triplet_loss(x, batch_size, tile_b=None):
    """x: (3*batch_size, D) float32, rows interleaved anchor/positive/negative.

    Returns (dist_p (B,), dist_n (B,), loss scalar) -- same as the PyTorch module
    with triplet_categorie='all', filter_loss=False.
    """
    total, d = x.shape
    assert total == 3 * batch_size
    x = x.astype(jnp.float32)
    # TODO(synk): if upstream can deliver bf16 embeddings, accept bf16 here and upcast
    # in-kernel (this kernel is HBM-bandwidth bound, so that is a near-2x win).

    # Free reshape of the interleaved (3B, D) layout: one contiguous row per triplet.
    # No padding copies: the last dim is passed at its full (possibly non-128) size.
    x2 = x.reshape(batch_size, 3 * d)

    kind = ""
    try:
        kind = jax.devices()[0].device_kind.lower()
    except Exception:
        pass
    is_v7 = "v7" in kind

    lanes_3d = _round_up(3 * d, 128)              # VMEM lane footprint of the input row
    lanes_d = _round_up(d, 128)                   # footprint of diff/square intermediates
    # Per-row VMEM cost model: double-buffered input block + ~4 intermediates.
    vmem_bytes_per_row = (2 * lanes_3d + 4 * lanes_d) * 4
    vmem_budget = (16 if is_v7 else 32) * 1024 * 1024   # v7x has only 64 MiB physical VMEM
    vmem_limit = (32 if is_v7 else 64) * 1024 * 1024

    if tile_b is None:
        tile_b = max(128, (vmem_budget // vmem_bytes_per_row) // 128 * 128)
    else:
        tile_b = max(128, _round_up(int(tile_b), 128))
    tile_b = min(tile_b, _round_up(batch_size, 128))
    if is_v7 and batch_size > 128:
        # Keep >= 2 grid tiles so the "parallel" axis feeds both v7x TensorCores.
        tile_b = min(tile_b, max(128, _round_up(pl.cdiv(batch_size, 2), 128)))

    num_tiles = pl.cdiv(batch_size, tile_b)

    kernel = functools.partial(_triplet_kernel, d=d, tile_b=tile_b,
                               batch_size=batch_size)

    dp_out, dn_out, lsum = pl.pallas_call(
        kernel,
        out_shape=(
            jax.ShapeDtypeStruct((1, num_tiles * tile_b), jnp.float32),
            jax.ShapeDtypeStruct((1, num_tiles * tile_b), jnp.float32),
            jax.ShapeDtypeStruct((num_tiles, 1, 128), jnp.float32),
        ),
        grid=(num_tiles,),
        in_specs=[pl.BlockSpec((tile_b, 3 * d), lambda i: (i, 0))],
        out_specs=(
            pl.BlockSpec((1, tile_b), lambda i: (0, i)),
            pl.BlockSpec((1, tile_b), lambda i: (0, i)),
            pl.BlockSpec((1, 1, 128), lambda i: (i, 0, 0)),
        ),
        compiler_params=pltpu.CompilerParams(
            dimension_semantics=("parallel",),
            vmem_limit_bytes=vmem_limit,
        ),
        cost_estimate=pl.CostEstimate(
            flops=int(10 * batch_size * d),
            transcendentals=int(2 * batch_size),
            bytes_accessed=int(4 * (batch_size * 3 * d + 2 * num_tiles * tile_b
                                    + num_tiles * 128)),
        ),
    )(x2)

    dist_p = dp_out[0, :batch_size]
    dist_n = dn_out[0, :batch_size]
    loss = jnp.sum(lsum[:, 0, 0]) / batch_size
    return dist_p, dist_n, loss


def _reference(x, batch_size):
    xr = x.reshape(batch_size, 3, -1)
    a, p, n = xr[:, 0, :], xr[:, 1, :], xr[:, 2, :]
    dp = jnp.sqrt(jnp.sum((a - p + EPS) ** 2, axis=-1))
    dn = jnp.sqrt(jnp.sum((a - n + EPS) ** 2, axis=-1))
    margin = jnp.abs(dp + dn) * 0.5
    loss = jnp.mean(jnp.maximum(0.0, dp + margin - dn))
    return dp, dn, loss


if __name__ == "__main__":
    key = jax.random.PRNGKey(0)
    k1, k2 = jax.random.split(key)

    # Case 1: feature dim NOT a multiple of 128 (unaligned slices, no pad copies),
    # batch smaller than one tile (exercises partial-block masking).
    b1, d1 = 20, 40
    x1 = jax.random.normal(k1, (3 * b1, d1), dtype=jnp.float32)
    dp1, dn1, l1 = adaptative_triplet_loss(x1, b1)
    jax.block_until_ready((dp1, dn1, l1))
    rdp1, rdn1, rl1 = _reference(x1, b1)
    assert jnp.allclose(dp1, rdp1, atol=1e-5, rtol=1e-4)
    assert jnp.allclose(dn1, rdn1, atol=1e-5, rtol=1e-4)
    assert jnp.allclose(l1, rl1, atol=1e-5, rtol=1e-4)

    # Case 2: lane-aligned feature dim, multi-tile grid with a partial trailing block.
    b2, d2 = 300, 256
    x2 = jax.random.normal(k2, (3 * b2, d2), dtype=jnp.float32)
    dp2, dn2, l2 = adaptative_triplet_loss(x2, b2, tile_b=128)
    jax.block_until_ready((dp2, dn2, l2))
    rdp2, rdn2, rl2 = _reference(x2, b2)
    assert jnp.allclose(dp2, rdp2, atol=1e-5, rtol=1e-4)
    assert jnp.allclose(dn2, rdn2, atol=1e-5, rtol=1e-4)
    assert jnp.allclose(l2, rl2, atol=1e-5, rtol=1e-4)

    print("KERNEL_OK")
</pallas_src>

<mosaic_0001>
module attributes {stable_mosaic.version = 11 : i64} {
  func.func @_triplet_kernel(%arg0: i32, %arg1: memref<128x120xf32, #tpu.memory_space<vmem>>, %arg2: memref<1x128xf32, #tpu.memory_space<vmem>>, %arg3: memref<1x128xf32, #tpu.memory_space<vmem>>, %arg4: memref<1x1x128xf32, #tpu.memory_space<vmem>>) attributes {dimension_semantics = [#tpu.dimension_semantics<parallel>], iteration_bounds = array<i64: 1>, scalar_prefetch = 0 : i64, scratch_operands = 0 : i64, tpu.core_type = #tpu.core_type<tc>, window_params = [{transform_indices = @transform_0, window_bounds = array<i64: 128, 120>}, {transform_indices = @transform_1, window_bounds = array<i64: 1, 128>}, {transform_indices = @transform_2, window_bounds = array<i64: 1, 128>}, {transform_indices = @transform_3, window_bounds = array<i64: 1, 1, 128>}]} {
    %c0 = arith.constant 0 : index
    %c0_0 = arith.constant 0 : index
    %0 = vector.load %arg1[%c0, %c0_0] : memref<128x120xf32, #tpu.memory_space<vmem>>, vector<128x40xf32>
    %c0_1 = arith.constant 0 : index
    %c40 = arith.constant 40 : index
    %1 = vector.load %arg1[%c0_1, %c40] : memref<128x120xf32, #tpu.memory_space<vmem>>, vector<128x40xf32>
    %c0_2 = arith.constant 0 : index
    %c80 = arith.constant 80 : index
    %2 = vector.load %arg1[%c0_2, %c80] : memref<128x120xf32, #tpu.memory_space<vmem>>, vector<128x40xf32>
    %3 = arith.subf %0, %1 : vector<128x40xf32>
    %cst = arith.constant 9.99999997E-7 : f32
    %4 = vector.broadcast %cst : f32 to vector<128x40xf32>
    %5 = arith.addf %3, %4 : vector<128x40xf32>
    %6 = arith.subf %0, %2 : vector<128x40xf32>
    %cst_3 = arith.constant 9.99999997E-7 : f32
    %7 = vector.broadcast %cst_3 : f32 to vector<128x40xf32>
    %8 = arith.addf %6, %7 : vector<128x40xf32>
    %cst_4 = arith.constant 1.000000e+00 : f32
    %9 = vector.broadcast %cst_4 : f32 to vector<1x40xf32>
    %10 = arith.mulf %5, %5 : vector<128x40xf32>
    %cst_5 = arith.constant dense<0.000000e+00> : vector<1x128xf32>
    %11 = tpu.matmul %9, %10, %cst_5 {dimension_numbers = #tpu.dot_dimension_numbers<[1], [1], [0], [0], [0, 0, 1, 0], [], []>, precision = #tpu.contract_precision<fp32>} : vector<1x40xf32>, vector<128x40xf32>, vector<1x128xf32> -> vector<1x128xf32>
    %12 = arith.mulf %8, %8 : vector<128x40xf32>
    %cst_6 = arith.constant dense<0.000000e+00> : vector<1x128xf32>
    %13 = tpu.matmul %9, %12, %cst_6 {dimension_numbers = #tpu.dot_dimension_numbers<[1], [1], [0], [0], [0, 0, 1, 0], [], []>, precision = #tpu.contract_precision<fp32>} : vector<1x40xf32>, vector<128x40xf32>, vector<1x128xf32> -> vector<1x128xf32>
    %14 = math.sqrt %11 : vector<1x128xf32>
    %15 = math.sqrt %13 : vector<1x128xf32>
    %c0_7 = arith.constant 0 : index
    %c0_8 = arith.constant 0 : index
    %16 = vector.load %arg2[%c0_7, %c0_8] : memref<1x128xf32, #tpu.memory_space<vmem>>, vector<1x128xf32>
    tpu.vector_store %arg2[%c0_7, %c0_8], %14 {strides = array<i32>} : memref<1x128xf32, #tpu.memory_space<vmem>>, vector<1x128xf32>,
    %c0_9 = arith.constant 0 : index
    %c0_10 = arith.constant 0 : index
    %17 = vector.load %arg3[%c0_9, %c0_10] : memref<1x128xf32, #tpu.memory_space<vmem>>, vector<1x128xf32>
    tpu.vector_store %arg3[%c0_9, %c0_10], %15 {strides = array<i32>} : memref<1x128xf32, #tpu.memory_space<vmem>>, vector<1x128xf32>,
    %cst_11 = arith.constant 1.500000e+00 : f32
    %18 = vector.broadcast %cst_11 : f32 to vector<1x128xf32>
    %19 = arith.mulf %18, %14 : vector<1x128xf32>
    %cst_12 = arith.constant 5.000000e-01 : f32
    %20 = vector.broadcast %cst_12 : f32 to vector<1x128xf32>
    %21 = arith.mulf %20, %15 : vector<1x128xf32>
    %22 = arith.subf %19, %21 : vector<1x128xf32>
    %cst_13 = arith.constant 0.000000e+00 : f32
    %23 = vector.broadcast %cst_13 : f32 to vector<1x128xf32>
    %24 = arith.maximumf %23, %22 : vector<1x128xf32>
    %25 = tpu.iota {dimensions = array<i32: 1>} : vector<1x128xi32>
    %c128_i32 = arith.constant 128 : i32
    %26 = arith.muli %arg0, %c128_i32 : i32
    %27 = vector.broadcast %26 : i32 to vector<1x128xi32>
    %28 = arith.addi %27, %25 : vector<1x128xi32>
    %c20_i32 = arith.constant 20 : i32
    %29 = vector.broadcast %c20_i32 : i32 to vector<1x128xi32>
    %30 = arith.cmpi slt, %28, %29 : vector<1x128xi32>
    %cst_14 = arith.constant 0.000000e+00 : f32
    %31 = vector.broadcast %cst_14 : f32 to vector<1x128xf32>
    %32 = arith.select %30, %24, %31 : vector<1x128xi1>, vector<1x128xf32>
    %cst_15 = arith.constant dense<0.000000e+00> : vector<1xf32>
    %33 = vector.multi_reduction <add>, %32, %cst_15 [1] : vector<1x128xf32> to vector<1xf32>
    %34 = vector.shape_cast %33 : vector<1xf32> to vector<1x1xf32>
    %35 = vector.shape_cast %34 : vector<1x1xf32> to vector<1x1x1xf32>
    %36 = vector.shape_cast %35 : vector<1x1x1xf32> to vector<1x1x1xf32>
    %37 = vector.broadcast %36 : vector<1x1x1xf32> to vector<1x1x128xf32>
    %c0_16 = arith.constant 0 : index
    %c0_17 = arith.constant 0 : index
    %c0_18 = arith.constant 0 : index
    %38 = vector.load %arg4[%c0_16, %c0_17, %c0_18] : memref<1x1x128xf32, #tpu.memory_space<vmem>>, vector<1x1x128xf32>
    tpu.vector_store %arg4[%c0_16, %c0_17, %c0_18], %37 {strides = array<i32>} : memref<1x1x128xf32, #tpu.memory_space<vmem>>, vector<1x1x128xf32>,
    return
  }
  func.func @transform_0(%arg0: i32) -> (i32, i32) {
    %c0_i32 = arith.constant 0 : i32
    %c0_i32_0 = arith.constant 0 : i32
    return %arg0, %c0_i32 : i32, i32
  }
  func.func @transform_1(%arg0: i32) -> (i32, i32) {
    %c0_i32 = arith.constant 0 : i32
    %c0_i32_0 = arith.constant 0 : i32
    return %c0_i32, %arg0 : i32, i32
  }
  func.func @transform_2(%arg0: i32) -> (i32, i32) {
    %c0_i32 = arith.constant 0 : i32
    %c0_i32_0 = arith.constant 0 : i32
    return %c0_i32, %arg0 : i32, i32
  }
  func.func @transform_3(%arg0: i32) -> (i32, i32, i32) {
    %c0_i32 = arith.constant 0 : i32
    %c0_i32_0 = arith.constant 0 : i32
    %c0_i32_1 = arith.constant 0 : i32
    return %arg0, %c0_i32, %c0_i32_0 : i32, i32, i32
  }
}

</mosaic_0001>

<bundles_post_ra>
// kernel: tpu_custom_call.1
= control target key start
LH: loop header
LB: loop body
LE: loop exit
PB: predicated region body
PF: predicated region fallthrough
CT: control target
= control target key end

     0   :  { %9 = vsyncpa [#allocation3], 0  ;;  %s3341_s0 = inlined_call_operand.hbm [shape: f32[20,120], index: 0, kind: input, shape index: {}]   ;;  %s3342_s1 = inlined_call_operand.hbm [shape: f32[1,128], index: 1, kind: output, shape index: {0}]   ;;  %s3343_s2 = inlined_call_operand.hbm [shape: f32[1,128], index: 2, kind: output, shape index: {1}]   ;;  %s3344_s3 = inlined_call_operand.hbm [shape: f32[1,1,128], index: 3, kind: output, shape index: {2}]  }
   0x1   :  { %10 = vsyncpa [#allocation4], 0 }
   0x2   :  { %11 = vsyncpa [#allocation7], 0 }
   0x3   :  { %16 = vsyncadd [#allocation3], 1664  ;;  %s2443_s12 = smov [#allocation2]  }
   0x4   :  { %s17_s13 = sshll.u32 %s2443_s12, 4  ;;  %s18_s13 = int_to_ptr.vmem [resolvable:$true] %s17_s13 }
   0x5   :  { %s2365_s14 = scalar_lea.vmem %s18_s13, 384  ;;  %s2369_s15 = scalar_lea.vmem %s18_s13, 2048 }
   0x6   :  { %p2366_p0 = scmp.ne.s32.totalorder %s18_s13, %s2365_s14  ;;  %p2370_p1 = scmp.lt.s32.totalorder %s18_s13, %s18_s13 }
   0x7   :  { %p2371_p2 = scmp.lt.s32.totalorder %s2369_s15, %s2365_s14 }
   0x9   :  { %p2372_p3 = por %p2371_p2, %p2370_p1 }
   0xb   :  { %p2373_p4 = pnand %p2372_p3, %p2366_p0 }
   0xd   :  { %2376 = shalt.err (!%p2373_p4)
}
   0xe   :  { %s2444_s16 = smov 128   ;;  %s2445_s17 = smov 8  }
   0xf   :  { %23 = dma.hbm_to_vmem [thread:$0]  %s3341_s0, 384, %s18_s13, [#allocation3], %s2444_s16, %s2444_s16, %s2445_s17  }
  0x10   :  { %2437 = dma.done.wait [#allocation3], 2048  }
  0x11   :  { %2438 = vsyncadd [#allocation3], 4294965248  ;;  %v2446_v0 = vmov 0.0   ;;  %v2480_v1 = vld [vmem:[#allocation2 + $0x78] sm:$0xff]  ;;  %v2482_v2 = vld [vmem:[#allocation2 + $0x68] sm:$0xff]  ;;  %s2447_s20 = smov 88  }
  0x12   :  { %1917 = vmatprep.subr.mxu0 %v2446_v0  ;;  %1952 = vmatprep.subr.mxu1 %v2446_v0  ;;  %v2486_v3 = vld [vmem:[#allocation2 + $0x70] sm:$0xff]  ;;  %v2488_v4 = vld [vmem:[#allocation2 + $0x60] sm:$0xff]  ;;  %v2492_v5 = vld [vmem:[#allocation2 + $0x58] sm:$0xff]  ;;  %vm2448_vm0 = vmmov 0   ;;  %s2449_s0 = smov 48   ;;  %vm235_vm1 = vcmask 326656  }
  0x13   :  { %89 = vrot.lane.b32.xlu0 %v2480_v1, %s2447_s20  ;;  %85 = vrot.lane.b32.xlu1 %v2482_v2, %s2447_s20  ;;  %v2494_v6 = vld [vmem:[#allocation2 + $0x50] sm:$0xff]  ;;  %v2498_v7 = vld [vmem:[#allocation2 + $0x48] sm:$0xff]  ;;  %v2500_v8 = vld [vmem:[#allocation2 + $0x40] sm:$0xff]  ;;  %vm1660_vm7 = vcmask 1040384   ;;  %s2452_s21 = smov [#allocation6]   ;;  %s2453_s23 = smov [#allocation5]  }
  0x14   :  { %v2504_v9 = vld [vmem:[#allocation2 + $0x38] sm:$0xff]  ;;  %v2506_v10 = vld [vmem:[#allocation2 + $0x30] sm:$0xff]  ;;  %v2510_v11 = vld [vmem:[#allocation2 + $0x28] sm:$0xff]  ;;  %1949 = vmatprep.mubr.msk.f32.mxu0 %vm2448_vm0, %v2446_v0  ;;  %1984 = vmatprep.mubr.msk.f32.mxu1 %vm2448_vm0, %v2446_v0  ;;  %s1681_s22 = sshll.u32 %s2452_s21, 4  ;;  %s1671_s24 = sshll.u32 %s2453_s23, 4  ;;  %s1682_s22 = int_to_ptr.vmem [resolvable:$true] %s1681_s22  ;;  %s1672_s24 = int_to_ptr.vmem [resolvable:$true] %s1671_s24 }
  0x15   :  { %v2512_v12 = vld [vmem:[#allocation2 + $0x20] sm:$0xff]  ;;  %v2516_v13 = vld [vmem:[#allocation2 + $0x18] sm:$0xff]  ;;  %v2518_v14 = vld [vmem:[#allocation2 + $0x10] sm:$0xff]  ;;  %s2377_s25 = scalar_lea.vmem %s1682_s22, 16  ;;  %s2381_s26 = scalar_lea.vmem %s1682_s22, 32 }
  0x16   :  { %v2522_v15 = vld [vmem:[#allocation2 + $0x8] sm:$0xff]  ;;  %v2524_v16 = vld [vmem:[#allocation2] sm:$0xff]  ;;  %p2378_p5 = scmp.ne.s32.totalorder %s1682_s22, %s2377_s25  ;;  %p2382_p6 = scmp.lt.s32.totalorder %s1682_s22, %s1682_s22 }
  0x17   :  { %87 = vrot.lane.b32.xlu0 %v2486_v3, %s2447_s20  ;;  %83 = vrot.lane.b32.xlu1 %v2488_v4, %s2447_s20  ;;  %p2383_p7 = scmp.lt.s32.totalorder %s2381_s26, %s2377_s25 }
  0x19   :  { %p2384_p8 = por %p2383_p7, %p2382_p6 }
  0x1b   :  { %81 = vrot.lane.b32.xlu0 %v2492_v5, %s2447_s20  ;;  %79 = vrot.lane.b32.xlu1 %v2494_v6, %s2447_s20  ;;  %p2385_p9 = pnand %p2384_p8, %p2378_p5 }
  0x1f   :  { %77 = vrot.lane.b32.xlu0 %v2498_v7, %s2447_s20  ;;  %75 = vrot.lane.b32.xlu1 %v2500_v8, %s2447_s20 }
  0x23   :  { %73 = vrot.lane.b32.xlu0 %v2504_v9, %s2447_s20  ;;  %71 = vrot.lane.b32.xlu1 %v2506_v10, %s2447_s20 }
  0x27   :  { %69 = vrot.lane.b32.xlu0 %v2510_v11, %s2447_s20  ;;  %67 = vrot.lane.b32.xlu1 %v2512_v12, %s2447_s20 }
  0x2b   :  { %65 = vrot.lane.b32.xlu0 %v2516_v13, %s2447_s20  ;;  %63 = vrot.lane.b32.xlu1 %v2518_v14, %s2447_s20 }
  0x2f   :  { %61 = vrot.lane.b32.xlu0 %v2522_v15, %s2447_s20  ;;  %59 = vrot.lane.b32.xlu1 %v2524_v16, %s2447_s20 }
  0x33   :  { %169 = vrot.lane.b32.xlu0 %v2480_v1, %s2449_s0  ;;  %167 = vrot.lane.b32.xlu1 %v2486_v3, %s2449_s0 }
  0x37   :  { %165 = vrot.lane.b32.xlu0 %v2482_v2, %s2449_s0  ;;  %163 = vrot.lane.b32.xlu1 %v2488_v4, %s2449_s0 }
  0x3b   :  { %161 = vrot.lane.b32.xlu0 %v2492_v5, %s2449_s0  ;;  %159 = vrot.lane.b32.xlu1 %v2494_v6, %s2449_s0 }
  0x3f   :  { %157 = vrot.lane.b32.xlu0 %v2498_v7, %s2449_s0  ;;  %155 = vrot.lane.b32.xlu1 %v2500_v8, %s2449_s0 }
  0x43   :  { %153 = vrot.lane.b32.xlu0 %v2504_v9, %s2449_s0  ;;  %151 = vrot.lane.b32.xlu1 %v2506_v10, %s2449_s0 }
  0x47   :  { %149 = vrot.lane.b32.xlu0 %v2510_v11, %s2449_s0  ;;  %147 = vrot.lane.b32.xlu1 %v2512_v12, %s2449_s0 }
  0x4b   :  { %145 = vrot.lane.b32.xlu0 %v2516_v13, %s2449_s0  ;;  %143 = vrot.lane.b32.xlu1 %v2518_v14, %s2449_s0 }
  0x4f   :  { %141 = vrot.lane.b32.xlu0 %v2522_v15, %s2449_s0  ;;  %139 = vrot.lane.b32.xlu1 %v2524_v16, %s2449_s0 }
  0x85   :  { %v90_v17 = vpop.permute.xlu0 %89  ;;  %v86_v18 = vpop.permute.xlu1 %85 }
  0x86   :  { %v122_v19 = vsub.f32 %v2480_v1, %v90_v17  ;;  %v120_v20 = vsub.f32 %v2482_v2, %v86_v18 }
  0x88   :  { %v138_v21 = vadd.f32 1e-06, %v122_v19  ;;  %v136_v22 = vadd.f32 1e-06, %v120_v20 }
  0x89   :  { %v88_v23 = vpop.permute.xlu0 %87  ;;  %v84_v24 = vpop.permute.xlu1 %83 }
  0x8a   :  { %v234_v25 = vmul.f32 %v138_v21, %v138_v21  ;;  %v121_v26 = vsub.f32 %v2486_v3, %v88_v23  ;;  %v232_v27 = vmul.f32 %v136_v22, %v136_v22  ;;  %v119_v28 = vsub.f32 %v2488_v4, %v84_v24 }
  0x8c   :  { %v285_v29 = vsel %vm235_vm1, %v234_v25, 0  ;;  %v137_v30 = vadd.f32 1e-06, %v121_v26  ;;  %v279_v31 = vsel %vm235_vm1, %v232_v27, 0  ;;  %v135_v32 = vadd.f32 1e-06, %v119_v28 }
  0x8d   :  { %v2554_v33 = vand.u32 4294901760, %v285_v29  ;;  %v2556_v34 = vand.u32 4294901760, %v279_v31  ;;  %v82_v35 = vpop.permute.xlu0 %81  ;;  %v80_v36 = vpop.permute.xlu1 %79 }
  0x8e   :  { %v233_v37 = vmul.f32 %v137_v30, %v137_v30  ;;  %v231_v38 = vmul.f32 %v135_v32, %v135_v32  ;;  %v118_v39 = vsub.f32 %v2492_v5, %v82_v35  ;;  %v117_v40 = vsub.f32 %v2494_v6, %v80_v36 }
  0x8f   :  { %v2561_v41 = vsub.f32 %v285_v29, %v2554_v33  ;;  %v2564_v42 = vsub.f32 %v279_v31, %v2556_v34  ;;  %1918 = vmatpush3.xpose.msra.mxu0 %v2554_v33 }
  0x90   :  { %v282_v43 = vsel %vm235_vm1, %v233_v37, 0  ;;  %v276_v44 = vsel %vm235_vm1, %v231_v38, 0  ;;  %v134_v45 = vadd.f32 1e-06, %v118_v39  ;;  %1919 = vmatprep.subr.mxu0 %v2446_v0  ;;  %v133_v46 = vadd.f32 1e-06, %v117_v40 }
  0x91   :  { %v2570_v47 = vand.u32 4294901760, %v282_v43  ;;  %v2572_v48 = vand.u32 4294901760, %v276_v44  ;;  %v381_v49 = vand.u32 4294901760, %v2561_v41  ;;  %v78_v50 = vpop.permute.xlu0 %77  ;;  %v76_v51 = vpop.permute.xlu1 %75  ;;  %v395_v59 = vand.u32 4294901760, %v2564_v42 }
  0x92   :  { %v230_v52 = vmul.f32 %v134_v45, %v134_v45  ;;  %v229_v53 = vmul.f32 %v133_v46, %v133_v46  ;;  %v116_v54 = vsub.f32 %v2498_v7, %v78_v50  ;;  %v115_v55 = vsub.f32 %v2500_v8, %v76_v51 }
  0x93   :  { %v2578_v56 = vsub.f32 %v282_v43, %v2570_v47  ;;  %v2581_v57 = vsub.f32 %v276_v44, %v2572_v48  ;;  %1920 = vmatpush3.xpose.msra.mxu0 %v2570_v47  ;;  %v382_v58 = vsub.f32 %v2561_v41, %v381_v49  ;;  %v396_v27 = vsub.f32 %v2564_v42, %v395_v59 }
  0x94   :  { %v273_v60 = vsel %vm235_vm1, %v230_v52, 0  ;;  %v270_v61 = vsel %vm235_vm1, %v229_v53, 0  ;;  %1921 = vmatprep.subr.mxu0 %v2446_v0  ;;  %v132_v62 = vadd.f32 1e-06, %v116_v54  ;;  %v131_v63 = vadd.f32 1e-06, %v115_v55 }
  0x95   :  { %v2591_v17 = vand.u32 4294901760, %v273_v60  ;;  %v383_v18 = vand.u32 4294901760, %v382_v58  ;;  %v388_v19 = vand.u32 4294901760, %v2578_v56  ;;  %v74_v20 = vpop.permute.xlu0 %73  ;;  %v72_v21 = vpop.permute.xlu1 %71  ;;  %v2595_v24 = vand.u32 4294901760, %v270_v61 }
  0x96   :  { %v228_v22 = vmul.f32 %v132_v62, %v132_v62  ;;  %v114_v23 = vsub.f32 %v2504_v9, %v74_v20  ;;  %v227_v26 = vmul.f32 %v131_v63, %v131_v63  ;;  %v402_v28 = vand.u32 4294901760, %v2581_v57 }
  0x97   :  { %1922 = vmatpush3.xpose.msra.mxu0 %v2556_v34  ;;  %1953 = vmatpush3.xpose.msra.mxu1 %v383_v18  ;;  %v389_v25 = vsub.f32 %v2578_v56, %v388_v19  ;;  %v113_v29 = vsub.f32 %v2506_v10, %v72_v21  ;;  %v2609_v30 = vsub.f32 %v273_v60, %v2591_v17  ;;  %v397_v44 = vand.u32 4294901760, %v396_v27 }
  0x98   :  { %1923 = vmatprep.subr.mxu0 %v2446_v0  ;;  %1954 = vmatprep.subr.mxu1 %v2446_v0  ;;  %v267_v31 = vsel %vm235_vm1, %v228_v22, 0  ;;  %v130_v35 = vadd.f32 1e-06, %v114_v23  ;;  %v2613_v37 = vsub.f32 %v270_v61, %v2595_v24  ;;  %v264_v39 = vsel %vm235_vm1, %v227_v26, 0 }
  0x99   :  { %v390_v32 = vand.u32 4294901760, %v389_v25  ;;  %v70_v36 = vpop.permute.xlu0 %69  ;;  %v2616_v38 = vand.u32 4294901760, %v267_v31  ;;  %v403_v40 = vsub.f32 %v2581_v57, %v402_v28  ;;  %v129_v43 = vadd.f32 1e-06, %v113_v29  ;;  %v68_v51 = vpop.permute.xlu1 %67 }
  0x9a   :  { %v226_v45 = vmul.f32 %v130_v35, %v130_v35  ;;  %v409_v46 = vand.u32 4294901760, %v2609_v30  ;;  %v112_v50 = vsub.f32 %v2510_v11, %v70_v36  ;;  %v2626_v52 = vand.u32 4294901760, %v264_v39 }
  0x9b   :  { %1924 = vmatpush3.xpose.msra.mxu0 %v2572_v48  ;;  %1955 = vmatpush3.xpose.msra.mxu1 %v390_v32  ;;  %v2630_v53 = vsub.f32 %v267_v31, %v2616_v38  ;;  %v404_v54 = vand.u32 4294901760, %v403_v40  ;;  %v225_v55 = vmul.f32 %v129_v43, %v129_v43  ;;  %v416_v58 = vand.u32 4294901760, %v2613_v37 }
  0x9c   :  { %1925 = vmatprep.subr.mxu0 %v2446_v0  ;;  %1956 = vmatprep.subr.mxu1 %v2446_v0  ;;  %v261_v60 = vsel %vm235_vm1, %v226_v45, 0  ;;  %v410_v61 = vsub.f32 %v2609_v30, %v409_v46  ;;  %v128_v62 = vadd.f32 1e-06, %v112_v50  ;;  %v111_v63 = vsub.f32 %v2512_v12, %v68_v51 }
  0x9d   :  { %v66_v18 = vpop.permute.xlu0 %65  ;;  %v2641_v20 = vsub.f32 %v264_v39, %v2626_v52  ;;  %v2644_v21 = vand.u32 4294901760, %v261_v60  ;;  %v258_v22 = vsel %vm235_vm1, %v225_v55, 0  ;;  %v417_v23 = vsub.f32 %v2613_v37, %v416_v58  ;;  %v64_v32 = vpop.permute.xlu1 %63 }
  0x9e   :  { %v423_v25 = vand.u32 4294901760, %v2630_v53  ;;  %v411_v26 = vand.u32 4294901760, %v410_v61  ;;  %v224_v27 = vmul.f32 %v128_v62, %v128_v62  ;;  %v127_v29 = vadd.f32 1e-06, %v111_v63 }
  0x9f   :  { %1926 = vmatpush3.xpose.msra.mxu0 %v2591_v17  ;;  %1957 = vmatpush3.xpose.msra.mxu1 %v397_v44  ;;  %v110_v31 = vsub.f32 %v2516_v13, %v66_v18  ;;  %v2656_v35 = vsub.f32 %v261_v60, %v2644_v21  ;;  %v2658_v36 = vand.u32 4294901760, %v258_v22  ;;  %v418_v39 = vand.u32 4294901760, %v417_v23 }
  0xa0   :  { %1927 = vmatprep.subr.mxu0 %v2446_v0  ;;  %1958 = vmatprep.subr.mxu1 %v2446_v0  ;;  %v424_v40 = vsub.f32 %v2630_v53, %v423_v25  ;;  %v255_v13 = vsel %vm235_vm1, %v224_v27, 0  ;;  %v223_v43 = vmul.f32 %v127_v29, %v127_v29  ;;  %v430_v45 = vand.u32 4294901760, %v2641_v20 }
  0xa1   :  { %v126_v44 = vadd.f32 1e-06, %v110_v31  ;;  %v109_v50 = vsub.f32 %v2518_v14, %v64_v32  ;;  %v62_v51 = vpop.permute.xlu0 %61  ;;  %v2672_v55 = vand.u32 4294901760, %v255_v13  ;;  %v437_v63 = vand.u32 4294901760, %v2656_v35  ;;  %v60_v23 = vpop.permute.xlu1 %59 }
  0xa2   :  { %v425_v60 = vand.u32 4294901760, %v424_v40  ;;  %v252_v61 = vsel %vm235_vm1, %v223_v43, 0  ;;  %v431_v14 = vsub.f32 %v2641_v20, %v430_v45 }
  0xa3   :  { %1928 = vmatpush3.xpose.msra.mxu0 %v2595_v24  ;;  %1959 = vmatpush3.xpose.msra.mxu1 %v404_v54  ;;  %v2670_v54 = vsub.f32 %v258_v22, %v2658_v36  ;;  %v222_v62 = vmul.f32 %v126_v44, %v126_v44  ;;  %v125_v18 = vadd.f32 1e-06, %v109_v50  ;;  %v108_v22 = vsub.f32 %v2522_v15, %v62_v51 }
  0xa4   :  { %1929 = vmatprep.subr.mxu0 %v2446_v0  ;;  %1960 = vmatprep.subr.mxu1 %v2446_v0  ;;  %v2686_v27 = vand.u32 4294901760, %v252_v61  ;;  %v432_v31 = vand.u32 4294901760, %v431_v14  ;;  %v438_v15 = vsub.f32 %v2656_v35, %v437_v63 }
  0xa5   :  { %v249_v29 = vsel %vm235_vm1, %v222_v62, 0  ;;  %v3348_v32 = vand.u32 4294901760, %v2670_v54  ;;  %v124_v40 = vadd.f32 1e-06, %v108_v22 }
  0xa6   :  { %v2697_v43 = vand.u32 4294901760, %v249_v29  ;;  %v2702_v44 = vsub.f32 %v252_v61, %v2686_v27  ;;  %v439_v50 = vand.u32 4294901760, %v438_v15 }
  0xa7   :  { %1930 = vmatpush3.xpose.msra.mxu0 %v2616_v38  ;;  %1961 = vmatpush3.xpose.msra.mxu1 %v411_v26  ;;  %v2684_v26 = vsub.f32 %v255_v13, %v2672_v55  ;;  %v107_v13 = vsub.f32 %v2524_v16, %v60_v23  ;;  %v445_v51 = vsub.f32 %v2670_v54, %v3348_v32 }
  0xa8   :  { %1931 = vmatprep.subr.mxu0 %v2446_v0  ;;  %1962 = vmatprep.subr.mxu1 %v2446_v0  ;;  %v220_v62 = vmul.f32 %v124_v40, %v124_v40 }
  0xa9   :  { %v123_v14 = vadd.f32 1e-06, %v107_v13  ;;  %v446_v22 = vand.u32 4294901760, %v445_v51 }
  0xaa   :  { %v243_v15 = vsel %vm235_vm1, %v220_v62, 0 }
  0xab   :  { %1932 = vmatpush3.xpose.msra.mxu0 %v2626_v52  ;;  %1963 = vmatpush3.xpose.msra.mxu1 %v418_v39  ;;  %v221_v39 = vmul.f32 %v125_v18, %v125_v18  ;;  %v2711_v18 = vsub.f32 %v249_v29, %v2697_v43  ;;  %v2450_v29 = vmov 0   ;;  %v2730_v51 = vand.u32 4294901760, %v243_v15 }
  0xac   :  { %1933 = vmatprep.subr.mxu0 %v2446_v0  ;;  %1964 = vmatprep.subr.mxu1 %v2446_v0  ;;  %v237_v40 = vsel %vm235_vm1, 1.0, %v2450_v29 }
  0xad   :  { %v246_v16 = vsel %vm235_vm1, %v221_v39, 0  ;;  %v219_v39 = vmul.f32 %v123_v14, %v123_v14  ;;  %v3347_v13 = vand.u32 4294901760, %v2711_v18 }
  0xae   :  { %v2715_v61 = vand.u32 4294901760, %v246_v16 }
  0xaf   :  { %1934 = vmatpush3.xpose.msra.mxu0 %v2644_v21  ;;  %1965 = vmatpush3.xpose.msra.mxu1 %v425_v60  ;;  %v3345_v60 = vand.u32 4294901760, %v2684_v26  ;;  %v240_v14 = vsel %vm235_vm1, %v219_v39, 0 }
  0xb0   :  { %1935 = vmatprep.subr.mxu0 %v2446_v0  ;;  %1966 = vmatprep.subr.mxu1 %v2446_v0  ;;  %v2747_v29 = vand.u32 4294901760, %v240_v14 }
  0xb1   :  { %v452_v23 = vsub.f32 %v2684_v26, %v3345_v60 }
  0xb3   :  { %1936 = vmatpush3.xpose.msra.mxu0 %v2658_v36  ;;  %1967 = vmatpush3.xpose.msra.mxu1 %v432_v31  ;;  %v3346_v31 = vand.u32 4294901760, %v2702_v44  ;;  %v453_v60 = vand.u32 4294901760, %v452_v23  ;;  %v2745_v23 = vsub.f32 %v243_v15, %v2730_v51 }
  0xb4   :  { %1937 = vmatprep.subr.mxu0 %v2446_v0  ;;  %1968 = vmatprep.subr.mxu1 %v2446_v0 }
  0xb5   :  { %v459_v62 = vsub.f32 %v2702_v44, %v3346_v31 }
  0xb7   :  { %1938 = vmatpush3.xpose.msra.mxu0 %v2672_v55  ;;  %1969 = vmatpush3.xpose.msra.mxu1 %v439_v50  ;;  %v2728_v50 = vsub.f32 %v246_v16, %v2715_v61  ;;  %v466_v16 = vsub.f32 %v2711_v18, %v3347_v13  ;;  %v460_v31 = vand.u32 4294901760, %v459_v62  ;;  %v479_v13 = vand.u32 4294901760, %v2745_v23 }
  0xb8   :  { %1939 = vmatprep.subr.mxu0 %v2446_v0  ;;  %1970 = vmatprep.subr.mxu1 %v2446_v0 }
  0xb9   :  { %v3349_v39 = vand.u32 4294901760, %v2728_v50  ;;  %v467_v15 = vand.u32 4294901760, %v466_v16 }
  0xbb   :  { %1940 = vmatpush3.xpose.msra.mxu0 %v2686_v27  ;;  %1971 = vmatpush3.xpose.msra.mxu1 %v446_v22  ;;  %v2736_v22 = vsub.f32 %v237_v40, %v237_v40  ;;  %v473_v62 = vsub.f32 %v2728_v50, %v3349_v39 }
  0xbc   :  { %1941 = vmatprep.subr.mxu0 %v2446_v0  ;;  %1972 = vmatprep.subr.mxu1 %v2446_v0 }
  0xbd   :  { %v2751_v40 = vand.u32 4294901760, %v2736_v22 }
  0xbf   :  { %1942 = vmatpush3.xpose.msra.mxu0 %v2697_v43  ;;  %1973 = vmatpush3.xpose.msra.mxu1 %v453_v60  ;;  %v2757_v60 = vsub.f32 %v240_v14, %v2747_v29  ;;  %v371_v32 = vsub.f32 %v2736_v22, %v2751_v40  ;;  %v480_v14 = vsub.f32 %v2745_v23, %v479_v13 }
  0xc0   :  { %1943 = vmatprep.subr.mxu0 %v2446_v0  ;;  %1974 = vmatprep.subr.mxu1 %v2446_v0 }
  0xc1   :  { %v486_v16 = vand.u32 4294901760, %v2757_v60  ;;  %v2772_v39 = vand.u32 4294901760, %v371_v32 }
  0xc3   :  { %1944 = vmatpush3.xpose.msra.mxu0 %v2715_v61  ;;  %1975 = vmatpush3.xpose.msra.mxu1 %v460_v31  ;;  %v474_v31 = vand.u32 4294901760, %v473_v62  ;;  %v487_v62 = vsub.f32 %v2757_v60, %v486_v16 }
  0xc4   :  { %1945 = vmatprep.subr.mxu0 %v2446_v0  ;;  %1976 = vmatprep.subr.mxu1 %v2446_v0 }
  0xc5   :  { %v488_v32 = vand.u32 4294901760, %v487_v62 }
  0xc7   :  { %1946 = vmatpush3.xpose.msra.mxu0 %v2730_v51  ;;  %1977 = vmatpush3.xpose.msra.mxu1 %v467_v15  ;;  %v481_v15 = vand.u32 4294901760, %v480_v14 }
  0xc8   :  { %1947 = vmatprep.subr.mxu0 %v2446_v0  ;;  %1978 = vmatprep.subr.mxu1 %v2446_v0 }
  0xcb   :  { %1948 = vmatpush3.xpose.msra.mxu0 %v2747_v29  ;;  %1979 = vmatpush3.xpose.msra.mxu1 %v474_v31  ;;  %v2451_v31 = vmov 1.0  }
  0xcc   :  { %1980 = vmatprep.subr.mxu1 %v2446_v0  ;;  %1987 = vmatprep.subr.mxu0 %v2446_v0 }
  0xce   :  { %1950 = vmatmul.mubr.f32.vlgmr.msra.gmra.mxu0 %v2772_v39 }
  0xcf   :  { %1981 = vmatpush3.xpose.msra.mxu1 %v481_v15  ;;  %1988 = vmatpush3.xpose.msra.mxu0 %v2561_v41 }
  0xd0   :  { %1982 = vmatprep.subr.mxu1 %v2446_v0  ;;  %1989 = vmatprep.subr.mxu0 %v2446_v0 }
  0xd1   :  { %2019 = vmatprep.mubr.msk.f32.mxu0 %vm2448_vm0, %v2446_v0 }
  0xd3   :  { %1983 = vmatpush3.xpose.msra.mxu1 %v488_v32  ;;  %1990 = vmatpush3.xpose.msra.mxu0 %v2578_v56 }
  0xd4   :  { %1991 = vmatprep.subr.mxu0 %v2446_v0  ;;  %2022 = vmatprep.subr.mxu1 %v2446_v0 }
  0xd6   :  { %1985 = vmatmul.mubr.msk.f32.vlgmr.msra.gmra.mxu1 %vm235_vm1, %v2451_v31 }
  0xd7   :  { %1992 = vmatpush3.xpose.msra.mxu0 %v2564_v42  ;;  %2023 = vmatpush3.xpose.msra.mxu1 %v2554_v33  ;;  %v168_v42 = vpop.permute.xlu1 %167 }
  0xd8   :  { %1993 = vmatprep.subr.mxu0 %v2446_v0  ;;  %2024 = vmatprep.subr.mxu1 %v2446_v0 }
  0xd9   :  { %2054 = vmatprep.mubr.msk.f32.mxu1 %vm2448_vm0, %v2446_v0 }
  0xdb   :  { %1994 = vmatpush3.xpose.msra.mxu0 %v2581_v57  ;;  %2025 = vmatpush3.xpose.msra.mxu1 %v2570_v47  ;;  %v3352_v57 = vand.u32 4294901760, %v2702_v44 }
  0xdc   :  { %1995 = vmatprep.subr.mxu0 %v2446_v0  ;;  %2026 = vmatprep.subr.mxu1 %v2446_v0 }
  0xdf   :  { %1996 = vmatpush3.xpose.msra.mxu0 %v2609_v30  ;;  %2027 = vmatpush3.xpose.msra.mxu1 %v2556_v34 }
  0xe0   :  { %1997 = vmatprep.subr.mxu0 %v2446_v0  ;;  %2028 = vmatprep.subr.mxu1 %v2446_v0 }
  0xe3   :  { %1998 = vmatpush3.xpose.msra.mxu0 %v2613_v37  ;;  %2029 = vmatpush3.xpose.msra.mxu1 %v2572_v48 }
  0xe4   :  { %1999 = vmatprep.subr.mxu0 %v2446_v0  ;;  %2030 = vmatprep.subr.mxu1 %v2446_v0 }
  0xe7   :  { %2000 = vmatpush3.xpose.msra.mxu0 %v2630_v53  ;;  %2031 = vmatpush3.xpose.msra.mxu1 %v2591_v17 }
  0xe8   :  { %2001 = vmatprep.subr.mxu0 %v2446_v0  ;;  %2032 = vmatprep.subr.mxu1 %v2446_v0 }
  0xeb   :  { %2002 = vmatpush3.xpose.msra.mxu0 %v2641_v20  ;;  %2033 = vmatpush3.xpose.msra.mxu1 %v2595_v24 }
  0xec   :  { %2003 = vmatprep.subr.mxu0 %v2446_v0  ;;  %2034 = vmatprep.subr.mxu1 %v2446_v0 }
  0xef   :  { %2004 = vmatpush3.xpose.msra.mxu0 %v2656_v35  ;;  %2035 = vmatpush3.xpose.msra.mxu1 %v2616_v38 }
  0xf0   :  { %2005 = vmatprep.subr.mxu0 %v2446_v0  ;;  %2036 = vmatprep.subr.mxu1 %v2446_v0 }
  0xf3   :  { %2006 = vmatpush3.xpose.msra.mxu0 %v2670_v54  ;;  %2037 = vmatpush3.xpose.msra.mxu1 %v2626_v52 }
  0xf4   :  { %2007 = vmatprep.subr.mxu0 %v2446_v0  ;;  %2038 = vmatprep.subr.mxu1 %v2446_v0 }
  0xf7   :  { %2008 = vmatpush3.xpose.msra.mxu0 %v2684_v26  ;;  %2039 = vmatpush3.xpose.msra.mxu1 %v2644_v21 }
  0xf8   :  { %2009 = vmatprep.subr.mxu0 %v2446_v0  ;;  %2040 = vmatprep.subr.mxu1 %v2446_v0 }
  0xfb   :  { %2010 = vmatpush3.xpose.msra.mxu0 %v2702_v44  ;;  %2041 = vmatpush3.xpose.msra.mxu1 %v2658_v36 }
  0xfc   :  { %2011 = vmatprep.subr.mxu0 %v2446_v0  ;;  %2042 = vmatprep.subr.mxu1 %v2446_v0 }
  0xff   :  { %2012 = vmatpush3.xpose.msra.mxu0 %v2711_v18  ;;  %2043 = vmatpush3.xpose.msra.mxu1 %v2672_v55 }
 0x100   :  { %2013 = vmatprep.subr.mxu0 %v2446_v0  ;;  %2044 = vmatprep.subr.mxu1 %v2446_v0 }
 0x103   :  { %2014 = vmatpush3.xpose.msra.mxu0 %v2728_v50  ;;  %2045 = vmatpush3.xpose.msra.mxu1 %v2686_v27 }
 0x104   :  { %2015 = vmatprep.subr.mxu0 %v2446_v0  ;;  %2046 = vmatprep.subr.mxu1 %v2446_v0 }
 0x107   :  { %2016 = vmatpush3.xpose.msra.mxu0 %v2745_v23  ;;  %2047 = vmatpush3.xpose.msra.mxu1 %v2697_v43 }
 0x108   :  { %2017 = vmatprep.subr.mxu0 %v2446_v0  ;;  %2048 = vmatprep.subr.mxu1 %v2446_v0 }
 0x10b   :  { %2018 = vmatpush3.xpose.msra.mxu0 %v2757_v60  ;;  %2049 = vmatpush3.xpose.msra.mxu1 %v2715_v61 }
 0x10c   :  { %2050 = vmatprep.subr.mxu1 %v2446_v0  ;;  %2057 = vmatprep.subr.mxu0 %v2446_v0 }
 0x10e   :  { %2020 = vmatmul.mubr.f32.vlgmr.msra.gmra.mxu0 %v2736_v22 }
 0x10f   :  { %2051 = vmatpush3.xpose.msra.mxu1 %v2730_v51  ;;  %2058 = vmatpush3.xpose.msra.mxu0 %v381_v49  ;;  %v201_v49 = vsub.f32 %v2486_v3, %v168_v42 }
 0x110   :  { %2052 = vmatprep.subr.mxu1 %v2446_v0  ;;  %2059 = vmatprep.subr.mxu0 %v2446_v0 }
 0x111   :  { %2089 = vmatprep.mubr.msk.f32.mxu0 %vm2448_vm0, %v2446_v0 }
 0x113   :  { %2053 = vmatpush3.xpose.msra.mxu1 %v2747_v29  ;;  %2060 = vmatpush3.xpose.msra.mxu0 %v388_v19  ;;  %v164_v19 = vpop.permute.xlu1 %163 }
 0x114   :  { %2061 = vmatprep.subr.mxu0 %v2446_v0  ;;  %2092 = vmatprep.subr.mxu1 %v2446_v0  ;;  %v199_v37 = vsub.f32 %v2488_v4, %v164_v19 }
 0x116   :  { %2055 = vmatmul.mubr.f32.vlgmr.msra.gmra.mxu1 %v2751_v40 }
 0x117   :  { %2062 = vmatpush3.xpose.msra.mxu0 %v395_v59  ;;  %2093 = vmatpush3.xpose.msra.mxu1 %v2554_v33  ;;  %v170_v33 = vpop.permute.xlu0 %169  ;;  %v217_v59 = vadd.f32 1e-06, %v201_v49 }
 0x118   :  { %2063 = vmatprep.subr.mxu0 %v2446_v0  ;;  %2094 = vmatprep.subr.mxu1 %v2446_v0  ;;  %v202_v41 = vsub.f32 %v2480_v1, %v170_v33 }
 0x119   :  { %2124 = vmatprep.mubr.msk.f32.mxu1 %vm2448_vm0, %v2446_v0 }
 0x11b   :  { %2064 = vmatpush3.xpose.msra.mxu0 %v402_v28  ;;  %2095 = vmatpush3.xpose.msra.mxu1 %v2570_v47  ;;  %v3351_v47 = vand.u32 4294901760, %v2684_v26  ;;  %v166_v56 = vpop.permute.xlu0 %165  ;;  %v942_v28 = vmul.f32 %v217_v59, %v217_v59 }
 0x11c   :  { %2065 = vmatprep.subr.mxu0 %v2446_v0  ;;  %2096 = vmatprep.subr.mxu1 %v2446_v0 }
 0x11f   :  { %2066 = vmatpush3.xpose.msra.mxu0 %v409_v46  ;;  %2097 = vmatpush3.xpose.msra.mxu1 %v2556_v34  ;;  %v3350_v34 = vand.u32 4294901760, %v2670_v54 }
 0x120   :  { %2067 = vmatprep.subr.mxu0 %v2446_v0  ;;  %2098 = vmatprep.subr.mxu1 %v2446_v0 }
 0x123   :  { %2068 = vmatpush3.xpose.msra.mxu0 %v416_v58  ;;  %2099 = vmatpush3.xpose.msra.mxu1 %v2572_v48  ;;  %v218_v48 = vadd.f32 1e-06, %v202_v41  ;;  %v215_v58 = vadd.f32 1e-06, %v199_v37 }
 0x124   :  { %2069 = vmatprep.subr.mxu0 %v2446_v0  ;;  %2100 = vmatprep.subr.mxu1 %v2446_v0 }
 0x125   :  { %v943_v1 = vmul.f32 %v218_v48, %v218_v48 }
 0x127   :  { %2070 = vmatpush3.xpose.msra.mxu0 %v423_v25  ;;  %2101 = vmatpush3.xpose.msra.mxu1 %v2591_v17  ;;  %v200_v17 = vsub.f32 %v2482_v2, %v166_v56  ;;  %v990_v3 = vsel %vm235_vm1, %v943_v1, 0  ;;  %v162_v2 = vpop.permute.xlu0 %161 }
 0x128   :  { %2071 = vmatprep.subr.mxu0 %v2446_v0  ;;  %2102 = vmatprep.subr.mxu1 %v2446_v0  ;;  %v2928_v46 = vand.u32 4294901760, %v990_v3  ;;  %v198_v20 = vsub.f32 %v2492_v5, %v162_v2 }
 0x129   :  { %v216_v30 = vadd.f32 1e-06, %v200_v17 }
 0x12a   :  { %v2938_v4 = vsub.f32 %v990_v3, %v2928_v46 }
 0x12b   :  { %2072 = vmatpush3.xpose.msra.mxu0 %v430_v45  ;;  %2103 = vmatpush3.xpose.msra.mxu1 %v2595_v24  ;;  %v3353_v24 = vand.u32 4294901760, %v2711_v18  ;;  %v941_v53 = vmul.f32 %v216_v30, %v216_v30  ;;  %v214_v45 = vadd.f32 1e-06, %v198_v20  ;;  %v158_v54 = vpop.permute.xlu0 %157 }
 0x12c   :  { %2073 = vmatprep.subr.mxu0 %v2446_v0  ;;  %2104 = vmatprep.subr.mxu1 %v2446_v0 }
 0x12d   :  { %v984_v35 = vsel %vm235_vm1, %v941_v53, 0  ;;  %v939_v44 = vmul.f32 %v214_v45, %v214_v45 }
 0x12e   :  { %v2953_v26 = vand.u32 4294901760, %v984_v35 }
 0x12f   :  { %2074 = vmatpush3.xpose.msra.mxu0 %v437_v63  ;;  %2105 = vmatpush3.xpose.msra.mxu1 %v2616_v38  ;;  %v3354_v38 = vand.u32 4294901760, %v2728_v50  ;;  %v978_v60 = vsel %vm235_vm1, %v939_v44, 0 }
 0x130   :  { %2075 = vmatprep.subr.mxu0 %v2446_v0  ;;  %2106 = vmatprep.subr.mxu1 %v2446_v0 }
 0x133   :  { %2076 = vmatpush3.xpose.msra.mxu0 %v3350_v34  ;;  %2107 = vmatpush3.xpose.msra.mxu1 %v2626_v52  ;;  %v987_v52 = vsel %vm235_vm1, %v942_v28, 0 }
 0x134   :  { %2077 = vmatprep.subr.mxu0 %v2446_v0  ;;  %2108 = vmatprep.subr.mxu1 %v2446_v0  ;;  %v2940_v25 = vand.u32 4294901760, %v987_v52 }
 0x136   :  { %v2951_v63 = vsub.f32 %v987_v52, %v2940_v25 }
 0x137   :  { %2078 = vmatpush3.xpose.msra.mxu0 %v3351_v47  ;;  %2109 = vmatpush3.xpose.msra.mxu1 %v2644_v21  ;;  %v160_v21 = vpop.permute.xlu1 %159 }
 0x138   :  { %2079 = vmatprep.subr.mxu0 %v2446_v0  ;;  %2110 = vmatprep.subr.mxu1 %v2446_v0  ;;  %v197_v5 = vsub.f32 %v2494_v6, %v160_v21 }
 0x13b   :  { %2080 = vmatpush3.xpose.msra.mxu0 %v3352_v57  ;;  %2111 = vmatpush3.xpose.msra.mxu1 %v2658_v36  ;;  %v940_v36 = vmul.f32 %v215_v58, %v215_v58  ;;  %v156_v18 = vpop.permute.xlu1 %155 }
 0x13c   :  { %2081 = vmatprep.subr.mxu0 %v2446_v0  ;;  %2112 = vmatprep.subr.mxu1 %v2446_v0  ;;  %v195_v14 = vsub.f32 %v2500_v8, %v156_v18  ;;  %v2989_v8 = vand.u32 4294901760, %v978_v60 }
 0x13d   :  { %v981_v6 = vsel %vm235_vm1, %v940_v36, 0 }
 0x13e   :  { %v2967_v50 = vand.u32 4294901760, %v981_v6  ;;  %v211_v42 = vadd.f32 1e-06, %v195_v14  ;;  %v3002_v57 = vsub.f32 %v978_v60, %v2989_v8  ;;  %v2353_v14 = vld [vmem:[#allocation2 + $0x18] sm:$0xff] }
 0x13f   :  { %2082 = vmatpush3.xpose.msra.mxu0 %v3353_v24  ;;  %2113 = vmatpush3.xpose.msra.mxu1 %v2672_v55  ;;  %v1086_v55 = vand.u32 4294901760, %v2938_v4  ;;  %v152_v47 = vpop.permute.xlu1 %151 }
 0x140   :  { %2083 = vmatprep.subr.mxu0 %v2446_v0  ;;  %2114 = vmatprep.subr.mxu1 %v2446_v0  ;;  %v2982_v62 = vsub.f32 %v981_v6, %v2967_v50  ;;  %v936_v17 = vmul.f32 %v211_v42, %v211_v42  ;;  %v193_v19 = vsub.f32 %v2506_v10, %v152_v47  ;;  %v1114_v37 = vand.u32 4294901760, %v3002_v57 }
 0x142   :  { %v1107_v48 = vand.u32 4294901760, %v2982_v62  ;;  %v969_v2 = vsel %vm235_vm1, %v936_v17, 0  ;;  %v209_v52 = vadd.f32 1e-06, %v193_v19 }
 0x143   :  { %2084 = vmatpush3.xpose.msra.mxu0 %v3354_v38  ;;  %2115 = vmatpush3.xpose.msra.mxu1 %v2686_v27  ;;  %v213_v27 = vadd.f32 1e-06, %v197_v5  ;;  %v148_v58 = vpop.permute.xlu1 %147  ;;  %v3032_v36 = vand.u32 4294901760, %v969_v2 }
 0x144   :  { %2085 = vmatprep.subr.mxu0 %v2446_v0  ;;  %2116 = vmatprep.subr.mxu1 %v2446_v0  ;;  %v1108_v30 = vsub.f32 %v2982_v62, %v1107_v48  ;;  %v191_v45 = vsub.f32 %v2512_v12, %v148_v58  ;;  %v2355_v58 = vld [vmem:[#allocation2 + $0x8] sm:$0xff] }
 0x145   :  { %v938_v23 = vmul.f32 %v213_v27, %v213_v27  ;;  %v3046_v18 = vsub.f32 %v969_v2, %v3032_v36 }
 0x147   :  { %2086 = vmatpush3.xpose.msra.mxu0 %v479_v13  ;;  %2117 = vmatpush3.xpose.msra.mxu1 %v2697_v43  ;;  %v196_v43 = vsub.f32 %v2498_v7, %v158_v54  ;;  %v2965_v13 = vsub.f32 %v984_v35, %v2953_v26  ;;  %v1087_v7 = vsub.f32 %v2938_v4, %v1086_v55  ;;  %v1109_v35 = vand.u32 4294901760, %v1108_v30 }
 0x148   :  { %2087 = vmatprep.subr.mxu0 %v2446_v0  ;;  %2118 = vmatprep.subr.mxu1 %v2446_v0  ;;  %v934_v54 = vmul.f32 %v209_v52, %v209_v52 }
 0x149   :  { %v1100_v15 = vand.u32 4294901760, %v2965_v13  ;;  %v1088_v32 = vand.u32 4294901760, %v1087_v7 }
 0x14b   :  { %2088 = vmatpush3.xpose.msra.mxu0 %v486_v16  ;;  %2119 = vmatpush3.xpose.msra.mxu1 %v2715_v61  ;;  %v1093_v61 = vand.u32 4294901760, %v2951_v63  ;;  %v154_v16 = vpop.permute.xlu0 %153  ;;  %v1101_v1 = vsub.f32 %v2965_v13, %v1100_v15 }
 0x14c   :  { %2120 = vmatprep.subr.mxu1 %v2446_v0  ;;  %2127 = vmatprep.subr.mxu0 %v2446_v0  ;;  %v194_v41 = vsub.f32 %v2504_v9, %v154_v16 }
 0x14d   :  { %v1094_v33 = vsub.f32 %v2951_v63, %v1093_v61  ;;  %v1102_v10 = vand.u32 4294901760, %v1101_v1  ;;  %v2354_v1 = vld [vmem:[#allocation2 + $0x10] sm:$0xff] }
 0x14e   :  { %2090 = vmatmul.mubr.msk.f32.vlgmr.msra.gmra.mxu0 %vm235_vm1, %v2451_v31  ;;  %v210_v59 = vadd.f32 1e-06, %v194_v41 }
 0x14f   :  { %2121 = vmatpush3.xpose.msra.mxu1 %v2730_v51  ;;  %2128 = vmatpush3.xpose.msra.mxu0 %v2928_v46  ;;  %v212_v51 = vadd.f32 1e-06, %v196_v43  ;;  %v1095_v56 = vand.u32 4294901760, %v1094_v33  ;;  %v150_v24 = vpop.permute.xlu0 %149 }
 0x150   :  { %2122 = vmatprep.subr.mxu1 %v2446_v0  ;;  %2129 = vmatprep.subr.mxu0 %v2446_v0  ;;  %v935_v38 = vmul.f32 %v210_v59, %v210_v59  ;;  %v192_v53 = vsub.f32 %v2510_v11, %v150_v24  ;;  %v1115_v11 = vsub.f32 %v3002_v57, %v1114_v37 }
 0x151   :  { %2159 = vmatprep.mubr.msk.f32.mxu0 %vm2448_vm0, %v2446_v0  ;;  %v937_v34 = vmul.f32 %v212_v51, %v212_v51  ;;  %v963_v51 = vsel %vm235_vm1, %v934_v54, 0 }
 0x152   :  { %v966_v5 = vsel %vm235_vm1, %v935_v38, 0  ;;  %v208_v6 = vadd.f32 1e-06, %v192_v53  ;;  %v1116_v7 = vand.u32 4294901760, %v1115_v11  ;;  %v3062_v41 = vand.u32 4294901760, %v963_v51 }
 0x153   :  { %2123 = vmatpush3.xpose.msra.mxu1 %v2747_v29  ;;  %2130 = vmatpush3.xpose.msra.mxu0 %v2940_v25  ;;  %v975_v29 = vsel %vm235_vm1, %v938_v23, 0  ;;  %v972_v9 = vsel %vm235_vm1, %v937_v34, 0  ;;  %v146_v27 = vpop.permute.xlu0 %145  ;;  %v3041_v44 = vand.u32 4294901760, %v966_v5  ;;  %v207_v23 = vadd.f32 1e-06, %v191_v45 }
 0x154   :  { %2131 = vmatprep.subr.mxu0 %v2446_v0  ;;  %2162 = vmatprep.subr.mxu1 %v2446_v0  ;;  %v2997_v49 = vand.u32 4294901760, %v975_v29  ;;  %v3015_v28 = vand.u32 4294901760, %v972_v9  ;;  %v933_v60 = vmul.f32 %v208_v6, %v208_v6  ;;  %v190_v16 = vsub.f32 %v2353_v14, %v146_v27 }
 0x155   :  { %v3054_v33 = vsub.f32 %v966_v5, %v3041_v44  ;;  %v1135_v34 = vand.u32 4294901760, %v3046_v18  ;;  %v932_v47 = vmul.f32 %v207_v23, %v207_v23  ;;  %v3070_v30 = vsub.f32 %v963_v51, %v3062_v41  ;;  %v2356_v51 = vld [vmem:[#allocation2] sm:$0xff] }
 0x156   :  { %2125 = vmatmul.mubr.msk.f32.vlgmr.msra.gmra.mxu1 %vm235_vm1, %v2451_v31  ;;  %v3013_v3 = vsub.f32 %v975_v29, %v2997_v49  ;;  %v3028_v21 = vsub.f32 %v972_v9, %v3015_v28  ;;  %v206_v9 = vadd.f32 1e-06, %v190_v16 }
 0x157   :  { %2132 = vmatpush3.xpose.msra.mxu0 %v2953_v26  ;;  %2163 = vmatpush3.xpose.msra.mxu1 %v1088_v32  ;;  %v144_v32 = vpop.permute.xlu1 %143  ;;  %v142_v17 = vpop.permute.xlu0 %141  ;;  %v1142_v19 = vand.u32 4294901760, %v3054_v33  ;;  %v957_v38 = vsel %vm235_vm1, %v932_v47, 0  ;;  %v1136_v2 = vsub.f32 %v3046_v18, %v1135_v34  ;;  %v1149_v45 = vand.u32 4294901760, %v3070_v30 }
 0x158   :  { %2133 = vmatprep.subr.mxu0 %v2446_v0  ;;  %2164 = vmatprep.subr.mxu1 %v2446_v0  ;;  %v1121_v20 = vand.u32 4294901760, %v3013_v3  ;;  %v1128_v43 = vand.u32 4294901760, %v3028_v21  ;;  %v189_v59 = vsub.f32 %v2354_v1, %v144_v32  ;;  %v931_v52 = vmul.f32 %v206_v9, %v206_v9 }
 0x159   :  { %2194 = vmatprep.mubr.msk.f32.mxu1 %vm2448_vm0, %v2446_v0  ;;  %v3079_v11 = vand.u32 4294901760, %v957_v38  ;;  %v1137_v6 = vand.u32 4294901760, %v1136_v2  ;;  %v1143_v27 = vsub.f32 %v3054_v33, %v1142_v19 }
 0x15a   :  { %v1122_v12 = vsub.f32 %v3013_v3, %v1121_v20  ;;  %v1129_v29 = vsub.f32 %v3028_v21, %v1128_v43  ;;  %v205_v53 = vadd.f32 1e-06, %v189_v59 }
 0x15b   :  { %2134 = vmatpush3.xpose.msra.mxu0 %v2967_v50  ;;  %2165 = vmatpush3.xpose.msra.mxu1 %v1095_v56  ;;  %v960_v56 = vsel %vm235_vm1, %v933_v60, 0  ;;  %v140_v5 = vpop.permute.xlu1 %139  ;;  %v3093_v14 = vsub.f32 %v957_v38, %v3079_v11 }
 0x15c   :  { %2135 = vmatprep.subr.mxu0 %v2446_v0  ;;  %2166 = vmatprep.subr.mxu1 %v2446_v0  ;;  %v1123_v42 = vand.u32 4294901760, %v1122_v12  ;;  %v1130_v24 = vand.u32 4294901760, %v1129_v29  ;;  %v930_v12 = vmul.f32 %v205_v53, %v205_v53  ;;  %v187_v60 = vsub.f32 %v2356_v51, %v140_v5 }
 0x15d   :  { %v1144_v29 = vand.u32 4294901760, %v1143_v27  ;;  %v1163_v1 = vand.u32 4294901760, %v3093_v14 }
 0x15e   :  { %v951_v47 = vsel %vm235_vm1, %v930_v12, 0  ;;  %v203_v9 = vadd.f32 1e-06, %v187_v60 }
 0x15f   :  { %2136 = vmatpush3.xpose.msra.mxu0 %v2989_v8  ;;  %2167 = vmatpush3.xpose.msra.mxu1 %v1102_v10  ;;  %v3072_v10 = vand.u32 4294901760, %v960_v56  ;;  %v1164_v53 = vsub.f32 %v3093_v14, %v1163_v1 }
 0x160   :  { %2137 = vmatprep.subr.mxu0 %v2446_v0  ;;  %2168 = vmatprep.subr.mxu1 %v2446_v0 }
 0x161   :  { %v3085_v54 = vsub.f32 %v960_v56, %v3072_v10 }
 0x163   :  { %2138 = vmatpush3.xpose.msra.mxu0 %v2997_v49  ;;  %2169 = vmatpush3.xpose.msra.mxu1 %v1109_v35  ;;  %v188_v35 = vsub.f32 %v2355_v58, %v142_v17  ;;  %v1156_v16 = vand.u32 4294901760, %v3085_v54  ;;  %v3111_v17 = vand.u32 4294901760, %v951_v47 }
 0x164   :  { %2139 = vmatprep.subr.mxu0 %v2446_v0  ;;  %2170 = vmatprep.subr.mxu1 %v2446_v0 }
 0x165   :  { %v204_v23 = vadd.f32 1e-06, %v188_v35  ;;  %v1157_v38 = vsub.f32 %v3085_v54, %v1156_v16  ;;  %v3125_v35 = vsub.f32 %v951_v47, %v3111_v17 }
 0x167   :  { %2140 = vmatpush3.xpose.msra.mxu0 %v3015_v28  ;;  %2171 = vmatpush3.xpose.msra.mxu1 %v1116_v7  ;;  %v954_v7 = vsel %vm235_vm1, %v931_v52, 0  ;;  %v929_v56 = vmul.f32 %v204_v23, %v204_v23  ;;  %v928_v52 = vmul.f32 %v203_v9, %v203_v9  ;;  %v1177_v12 = vand.u32 4294901760, %v3125_v35 }
 0x168   :  { %2141 = vmatprep.subr.mxu0 %v2446_v0  ;;  %2172 = vmatprep.subr.mxu1 %v2446_v0  ;;  %v3098_v32 = vand.u32 4294901760, %v954_v7 }
 0x169   :  { %v948_v2 = vsel %vm235_vm1, %v929_v56, 0  ;;  %v945_v27 = vsel %vm235_vm1, %v928_v52, 0  ;;  %v1178_v56 = vsub.f32 %v3125_v35, %v1177_v12 }
 0x16a   :  { %v3109_v59 = vsub.f32 %v954_v7, %v3098_v32  ;;  %v3127_v5 = vand.u32 4294901760, %v948_v2  ;;  %v1165_v7 = vand.u32 4294901760, %v1164_v53  ;;  %v3137_v51 = vand.u32 4294901760, %v945_v27 }
 0x16b   :  { %2142 = vmatpush3.xpose.msra.mxu0 %v3032_v36  ;;  %2173 = vmatpush3.xpose.msra.mxu1 %v1123_v42  ;;  %v1150_v42 = vsub.f32 %v3070_v30, %v1149_v45 }
 0x16c   :  { %2143 = vmatprep.subr.mxu0 %v2446_v0  ;;  %2174 = vmatprep.subr.mxu1 %v2446_v0  ;;  %v1170_v58 = vand.u32 4294901760, %v3109_v59  ;;  %v3135_v23 = vsub.f32 %v948_v2, %v3127_v5 }
 0x16e   :  { %v1171_v60 = vsub.f32 %v3109_v59, %v1170_v58 }
 0x16f   :  { %2144 = vmatpush3.xpose.msra.mxu0 %v3041_v44  ;;  %2175 = vmatpush3.xpose.msra.mxu1 %v1130_v24  ;;  %v1151_v24 = vand.u32 4294901760, %v1150_v42  ;;  %v3147_v42 = vsub.f32 %v945_v27, %v3137_v51 }
 0x170   :  { %2145 = vmatprep.subr.mxu0 %v2446_v0  ;;  %2176 = vmatprep.subr.mxu1 %v2446_v0  ;;  %v1172_v47 = vand.u32 4294901760, %v1171_v60 }
 0x171   :  { %v1191_v9 = vand.u32 4294901760, %v3147_v42 }
 0x173   :  { %2146 = vmatpush3.xpose.msra.mxu0 %v3062_v41  ;;  %2177 = vmatpush3.xpose.msra.mxu1 %v1137_v6  ;;  %v1158_v6 = vand.u32 4294901760, %v1157_v38  ;;  %v1192_v52 = vsub.f32 %v3147_v42, %v1191_v9 }
 0x174   :  { %2147 = vmatprep.subr.mxu0 %v2446_v0  ;;  %2178 = vmatprep.subr.mxu1 %v2446_v0 }
 0x175   :  { %v1193_v27 = vand.u32 4294901760, %v1192_v52 }
 0x177   :  { %2148 = vmatpush3.xpose.msra.mxu0 %v3072_v10  ;;  %2179 = vmatpush3.xpose.msra.mxu1 %v1144_v29  ;;  %v1184_v29 = vand.u32 4294901760, %v3135_v23 }
 0x178   :  { %2149 = vmatprep.subr.mxu0 %v2446_v0  ;;  %2180 = vmatprep.subr.mxu1 %v2446_v0 }
 0x179   :  { %v1185_v38 = vsub.f32 %v3135_v23, %v1184_v29 }
 0x17b   :  { %2150 = vmatpush3.xpose.msra.mxu0 %v3079_v11  ;;  %2181 = vmatpush3.xpose.msra.mxu1 %v1151_v24  ;;  %v1179_v24 = vand.u32 4294901760, %v1178_v56  ;;  %v1186_v2 = vand.u32 4294901760, %v1185_v38 }
 0x17c   :  { %2151 = vmatprep.subr.mxu0 %v2446_v0  ;;  %2182 = vmatprep.subr.mxu1 %v2446_v0 }
 0x17f   :  { %2152 = vmatpush3.xpose.msra.mxu0 %v3098_v32  ;;  %2183 = vmatpush3.xpose.msra.mxu1 %v1158_v6 }
 0x180   :  { %2153 = vmatprep.subr.mxu0 %v2446_v0  ;;  %2184 = vmatprep.subr.mxu1 %v2446_v0 }
 0x183   :  { %2154 = vmatpush3.xpose.msra.mxu0 %v3111_v17  ;;  %2185 = vmatpush3.xpose.msra.mxu1 %v1165_v7 }
 0x184   :  { %2155 = vmatprep.subr.mxu0 %v2446_v0  ;;  %2186 = vmatprep.subr.mxu1 %v2446_v0 }
 0x187   :  { %2156 = vmatpush3.xpose.msra.mxu0 %v3127_v5  ;;  %2187 = vmatpush3.xpose.msra.mxu1 %v1172_v47 }
 0x188   :  { %2157 = vmatprep.subr.mxu0 %v2446_v0  ;;  %2188 = vmatprep.subr.mxu1 %v2446_v0 }
 0x18b   :  { %2158 = vmatpush3.xpose.msra.mxu0 %v3137_v51  ;;  %2189 = vmatpush3.xpose.msra.mxu1 %v1179_v24 }
 0x18c   :  { %2190 = vmatprep.subr.mxu1 %v2446_v0  ;;  %2197 = vmatprep.subr.mxu0 %v2446_v0 }
 0x18e   :  { %2160 = vmatmul.mubr.f32.vlgmr.msra.gmra.mxu0 %v2772_v39  ;;  %v374_v53 = vpop.f32.mrf.mxu0 }
 0x18f   :  { %2191 = vmatpush3.xpose.msra.mxu1 %v1186_v2  ;;  %2198 = vmatpush3.xpose.msra.mxu0 %v2938_v4 }
 0x190   :  { %2192 = vmatprep.subr.mxu1 %v2446_v0  ;;  %2199 = vmatprep.subr.mxu0 %v2446_v0  ;;  %v1951_v6 = vpop.f32.mrf.mxu0 }
 0x191   :  { %2229 = vmatprep.mubr.msk.f32.mxu0 %vm2448_vm0, %v2446_v0 }
 0x193   :  { %2193 = vmatpush3.xpose.msra.mxu1 %v1193_v27  ;;  %2200 = vmatpush3.xpose.msra.mxu0 %v2951_v63 }
 0x194   :  { %2201 = vmatprep.subr.mxu0 %v2446_v0  ;;  %2232 = vmatprep.subr.mxu1 %v2446_v0 }
 0x196   :  { %v525_v39 = vpop.f32.mrf.mxu1  ;;  %2195 = vmatmul.mubr.msk.f32.vlgmr.msra.gmra.mxu1 %vm235_vm1, %v2451_v31 }
 0x197   :  { %v526_v7 = vadd.f32 %v525_v39, %v374_v53  ;;  %2202 = vmatpush3.xpose.msra.mxu0 %v2965_v13  ;;  %2233 = vmatpush3.xpose.msra.mxu1 %v2928_v46 }
 0x198   :  { %v1986_v60 = vpop.f32.mrf.mxu1  ;;  %2203 = vmatprep.subr.mxu0 %v2446_v0  ;;  %2234 = vmatprep.subr.mxu1 %v2446_v0 }
 0x199   :  { %2264 = vmatprep.mubr.msk.f32.mxu1 %vm2448_vm0, %v2446_v0 }
 0x19b   :  { %2204 = vmatpush3.xpose.msra.mxu0 %v2982_v62  ;;  %2235 = vmatpush3.xpose.msra.mxu1 %v2940_v25 }
 0x19c   :  { %2205 = vmatprep.subr.mxu0 %v2446_v0  ;;  %2236 = vmatprep.subr.mxu1 %v2446_v0 }
 0x19f   :  { %2206 = vmatpush3.xpose.msra.mxu0 %v3002_v57  ;;  %2237 = vmatpush3.xpose.msra.mxu1 %v2953_v26 }
 0x1a0   :  { %2207 = vmatprep.subr.mxu0 %v2446_v0  ;;  %2238 = vmatprep.subr.mxu1 %v2446_v0 }
 0x1a3   :  { %2208 = vmatpush3.xpose.msra.mxu0 %v3013_v3  ;;  %2239 = vmatpush3.xpose.msra.mxu1 %v2967_v50 }
 0x1a4   :  { %2209 = vmatprep.subr.mxu0 %v2446_v0  ;;  %2240 = vmatprep.subr.mxu1 %v2446_v0 }
 0x1a7   :  { %2210 = vmatpush3.xpose.msra.mxu0 %v3028_v21  ;;  %2241 = vmatpush3.xpose.msra.mxu1 %v2989_v8 }
 0x1a8   :  { %2211 = vmatprep.subr.mxu0 %v2446_v0  ;;  %2242 = vmatprep.subr.mxu1 %v2446_v0 }
 0x1ab   :  { %2212 = vmatpush3.xpose.msra.mxu0 %v3046_v18  ;;  %2243 = vmatpush3.xpose.msra.mxu1 %v2997_v49 }
 0x1ac   :  { %2213 = vmatprep.subr.mxu0 %v2446_v0  ;;  %2244 = vmatprep.subr.mxu1 %v2446_v0 }
 0x1af   :  { %2214 = vmatpush3.xpose.msra.mxu0 %v3054_v33  ;;  %2245 = vmatpush3.xpose.msra.mxu1 %v3015_v28 }
 0x1b0   :  { %2215 = vmatprep.subr.mxu0 %v2446_v0  ;;  %2246 = vmatprep.subr.mxu1 %v2446_v0 }
 0x1b3   :  { %2216 = vmatpush3.xpose.msra.mxu0 %v3070_v30  ;;  %2247 = vmatpush3.xpose.msra.mxu1 %v3032_v36  ;;  %v1653_v30 = vlaneseq }
 0x1b4   :  { %2217 = vmatprep.subr.mxu0 %v2446_v0  ;;  %2248 = vmatprep.subr.mxu1 %v2446_v0 }
 0x1b7   :  { %2218 = vmatpush3.xpose.msra.mxu0 %v3085_v54  ;;  %2249 = vmatpush3.xpose.msra.mxu1 %v3041_v44 }
 0x1b8   :  { %2219 = vmatprep.subr.mxu0 %v2446_v0  ;;  %2250 = vmatprep.subr.mxu1 %v2446_v0 }
 0x1bb   :  { %2220 = vmatpush3.xpose.msra.mxu0 %v3093_v14  ;;  %2251 = vmatpush3.xpose.msra.mxu1 %v3062_v41  ;;  %v1654_v14 = vand.u32 127, %v1653_v30 }
 0x1bc   :  { %2221 = vmatprep.subr.mxu0 %v2446_v0  ;;  %2252 = vmatprep.subr.mxu1 %v2446_v0 }
 0x1bd   :  { %vm1658_vm6 = vcmp.lt.s32.totalorder %v1654_v14, 20 }
 0x1bf   :  { %2222 = vmatpush3.xpose.msra.mxu0 %v3109_v59  ;;  %2253 = vmatpush3.xpose.msra.mxu1 %v3072_v10 }
 0x1c0   :  { %2223 = vmatprep.subr.mxu0 %v2446_v0  ;;  %2254 = vmatprep.subr.mxu1 %v2446_v0 }
 0x1c3   :  { %2224 = vmatpush3.xpose.msra.mxu0 %v3125_v35  ;;  %2255 = vmatpush3.xpose.msra.mxu1 %v3079_v11 }
 0x1c4   :  { %2225 = vmatprep.subr.mxu0 %v2446_v0  ;;  %2256 = vmatprep.subr.mxu1 %v2446_v0 }
 0x1c7   :  { %2226 = vmatpush3.xpose.msra.mxu0 %v3135_v23  ;;  %2257 = vmatpush3.xpose.msra.mxu1 %v3098_v32 }
 0x1c8   :  { %2227 = vmatprep.subr.mxu0 %v2446_v0  ;;  %2258 = vmatprep.subr.mxu1 %v2446_v0 }
 0x1cb   :  { %2228 = vmatpush3.xpose.msra.mxu0 %v3147_v42  ;;  %2259 = vmatpush3.xpose.msra.mxu1 %v3111_v17 }
 0x1cc   :  { %2260 = vmatprep.subr.mxu1 %v2446_v0  ;;  %2267 = vmatprep.subr.mxu0 %v2446_v0 }
 0x1ce   :  { %v629_v47 = vpop.f32.mrf.mxu0  ;;  %2230 = vmatmul.mubr.f32.vlgmr.msra.gmra.mxu0 %v2736_v22 }
 0x1cf   :  { %v3235_v56 = vadd.f32 %v629_v47, %v526_v7  ;;  %2261 = vmatpush3.xpose.msra.mxu1 %v3127_v5  ;;  %2268 = vmatpush3.xpose.msra.mxu0 %v1086_v55 }
 0x1d0   :  { %2262 = vmatprep.subr.mxu1 %v2446_v0  ;;  %2269 = vmatprep.subr.mxu0 %v2446_v0  ;;  %v2021_v24 = vpop.f32.mrf.mxu0 }
 0x1d1   :  { %2299 = vmatprep.mubr.msk.f32.mxu0 %vm2448_vm0, %v2446_v0 }
 0x1d3   :  { %2263 = vmatpush3.xpose.msra.mxu1 %v3137_v51  ;;  %2270 = vmatpush3.xpose.msra.mxu0 %v1093_v61 }
 0x1d4   :  { %2271 = vmatprep.subr.mxu0 %v2446_v0  ;;  %2302 = vmatprep.subr.mxu1 %v2446_v0 }
 0x1d6   :  { %v3249_v22 = vpop.f32.mrf.mxu1  ;;  %2265 = vmatmul.mubr.f32.vlgmr.msra.gmra.mxu1 %v2751_v40 }
 0x1d7   :  { %2272 = vmatpush3.xpose.msra.mxu0 %v1100_v15  ;;  %2303 = vmatpush3.xpose.msra.mxu1 %v2928_v46 }
 0x1d8   :  { %v2056_v4 = vpop.f32.mrf.mxu1  ;;  %2273 = vmatprep.subr.mxu0 %v2446_v0  ;;  %2304 = vmatprep.subr.mxu1 %v2446_v0 }
 0x1d9   :  { %2334 = vmatprep.mubr.msk.f32.mxu1 %vm2448_vm0, %v2446_v0 }
 0x1db   :  { %2274 = vmatpush3.xpose.msra.mxu0 %v1107_v48  ;;  %2305 = vmatpush3.xpose.msra.mxu1 %v2940_v25  ;;  %v719_v25 = vadd.f32 %v3249_v22, %v3235_v56 }
 0x1dc   :  { %2275 = vmatprep.subr.mxu0 %v2446_v0  ;;  %2306 = vmatprep.subr.mxu1 %v2446_v0 }
 0x1df   :  { %2276 = vmatpush3.xpose.msra.mxu0 %v1114_v37  ;;  %2307 = vmatpush3.xpose.msra.mxu1 %v2953_v26 }
 0x1e0   :  { %2277 = vmatprep.subr.mxu0 %v2446_v0  ;;  %2308 = vmatprep.subr.mxu1 %v2446_v0 }
 0x1e3   :  { %2278 = vmatpush3.xpose.msra.mxu0 %v1121_v20  ;;  %2309 = vmatpush3.xpose.msra.mxu1 %v2967_v50 }
 0x1e4   :  { %2279 = vmatprep.subr.mxu0 %v2446_v0  ;;  %2310 = vmatprep.subr.mxu1 %v2446_v0 }
 0x1e7   :  { %2280 = vmatpush3.xpose.msra.mxu0 %v1128_v43  ;;  %2311 = vmatpush3.xpose.msra.mxu1 %v2989_v8 }
 0x1e8   :  { %2281 = vmatprep.subr.mxu0 %v2446_v0  ;;  %2312 = vmatprep.subr.mxu1 %v2446_v0 }
 0x1eb   :  { %2282 = vmatpush3.xpose.msra.mxu0 %v1135_v34  ;;  %2313 = vmatpush3.xpose.msra.mxu1 %v2997_v49 }
 0x1ec   :  { %2283 = vmatprep.subr.mxu0 %v2446_v0  ;;  %2314 = vmatprep.subr.mxu1 %v2446_v0 }
 0x1ef   :  { %2284 = vmatpush3.xpose.msra.mxu0 %v1142_v19  ;;  %2315 = vmatpush3.xpose.msra.mxu1 %v3015_v28 }
 0x1f0   :  { %2285 = vmatprep.subr.mxu0 %v2446_v0  ;;  %2316 = vmatprep.subr.mxu1 %v2446_v0 }
 0x1f3   :  { %2286 = vmatpush3.xpose.msra.mxu0 %v1149_v45  ;;  %2317 = vmatpush3.xpose.msra.mxu1 %v3032_v36 }
 0x1f4   :  { %2287 = vmatprep.subr.mxu0 %v2446_v0  ;;  %2318 = vmatprep.subr.mxu1 %v2446_v0 }
 0x1f7   :  { %2288 = vmatpush3.xpose.msra.mxu0 %v1156_v16  ;;  %2319 = vmatpush3.xpose.msra.mxu1 %v3041_v44 }
 0x1f8   :  { %2289 = vmatprep.subr.mxu0 %v2446_v0  ;;  %2320 = vmatprep.subr.mxu1 %v2446_v0 }
 0x1fb   :  { %2290 = vmatpush3.xpose.msra.mxu0 %v1163_v1  ;;  %2321 = vmatpush3.xpose.msra.mxu1 %v3062_v41 }
 0x1fc   :  { %2291 = vmatprep.subr.mxu0 %v2446_v0  ;;  %2322 = vmatprep.subr.mxu1 %v2446_v0 }
 0x1ff   :  { %2292 = vmatpush3.xpose.msra.mxu0 %v1170_v58  ;;  %2323 = vmatpush3.xpose.msra.mxu1 %v3072_v10 }
 0x200   :  { %2293 = vmatprep.subr.mxu0 %v2446_v0  ;;  %2324 = vmatprep.subr.mxu1 %v2446_v0 }
 0x203   :  { %2294 = vmatpush3.xpose.msra.mxu0 %v1177_v12  ;;  %2325 = vmatpush3.xpose.msra.mxu1 %v3079_v11 }
 0x204   :  { %2295 = vmatprep.subr.mxu0 %v2446_v0  ;;  %2326 = vmatprep.subr.mxu1 %v2446_v0 }
 0x207   :  { %2296 = vmatpush3.xpose.msra.mxu0 %v1184_v29  ;;  %2327 = vmatpush3.xpose.msra.mxu1 %v3098_v32 }
 0x208   :  { %2297 = vmatprep.subr.mxu0 %v2446_v0  ;;  %2328 = vmatprep.subr.mxu1 %v2446_v0 }
 0x20b   :  { %2298 = vmatpush3.xpose.msra.mxu0 %v1191_v9  ;;  %2329 = vmatpush3.xpose.msra.mxu1 %v3111_v17 }
 0x20c   :  { %2330 = vmatprep.subr.mxu1 %v2446_v0 }
 0x20e   :  { %v837_v40 = vpop.f32.mrf.mxu0  ;;  %2300 = vmatmul.mubr.msk.f32.vlgmr.msra.gmra.mxu0 %vm235_vm1, %v2451_v31 }
 0x20f   :  { %2331 = vmatpush3.xpose.msra.mxu1 %v3127_v5  ;;  %v838_v55 = vadd.f32 %v837_v40, %v719_v25 }
 0x210   :  { %2332 = vmatprep.subr.mxu1 %v2446_v0  ;;  %v2091_v46 = vpop.f32.mrf.mxu0 }
 0x213   :  { %2333 = vmatpush3.xpose.msra.mxu1 %v3137_v51 }
 0x216   :  { %v924_v63 = vpop.f32.mrf.mxu1  ;;  %2335 = vmatmul.mubr.msk.f32.vlgmr.msra.gmra.mxu1 %vm235_vm1, %v2451_v31 }
 0x217   :  { %v925_v26 = vadd.f32 %v924_v63, %v838_v55 }
 0x218   :  { %v2126_v61 = vpop.f32.mrf.mxu1 }
 0x219   :  { %2349 = vrsqrt.f32 %v925_v26  ;;  %vm1635_vm2 = vcmp.eq.f32.partialorder %v925_v26, inf  ;;  %v1638_v15 = vand.u32 2147483648, %v925_v26  ;;  %vm1637_vm3 = vcmp.eq.f32.partialorder %v925_v26, 0.0 }
 0x226   :  { %v2350_v13 = vpop.eup %2349 }
 0x227   :  { %v1634_v50 = vmul.f32 %v2350_v13, %v925_v26 }
 0x229   :  { %v1636_v62 = vsel %vm1635_vm2, %v925_v26, %v1634_v50 }
 0x22a   :  { %v1639_v0 = vsel %vm1637_vm3, %v1638_v15, %v1636_v62 }
 0x22b   :  { %1647 = vst [vmem:[#allocation5] sm:$0x1] %v1639_v0  ;;  %v1649_v16 = vmul.f32 1.5, %v1639_v0 }
 0x24e   :  { %v1079_v8 = vpop.f32.mrf.mxu0 }
 0x250   :  { %v2161_v48 = vpop.f32.mrf.mxu0 }
 0x256   :  { %v1230_v49 = vpop.f32.mrf.mxu1 }
 0x257   :  { %v1231_v57 = vadd.f32 %v1230_v49, %v1079_v8 }
 0x258   :  { %v2196_v3 = vpop.f32.mrf.mxu1 }
 0x28e   :  { %v1334_v28 = vpop.f32.mrf.mxu0 }
 0x28f   :  { %v1335_v37 = vadd.f32 %v1334_v28, %v1231_v57 }
 0x290   :  { %v2231_v20 = vpop.f32.mrf.mxu0 }
 0x296   :  { %v1423_v31 = vpop.f32.mrf.mxu1 }
 0x297   :  { %v1424_v44 = vadd.f32 %v1423_v31, %v1335_v37 }
 0x298   :  { %v2266_v21 = vpop.f32.mrf.mxu1 }
 0x2ce   :  { %v1542_v36 = vpop.f32.mrf.mxu0 }
 0x2cf   :  { %v1543_v18 = vadd.f32 %v1542_v36, %v1424_v44 }
 0x2d0   :  { %v2301_v43 = vpop.f32.mrf.mxu0 }
 0x2d6   :  { %v1629_v33 = vpop.f32.mrf.mxu1 }
 0x2d7   :  { %v1630_v34 = vadd.f32 %v1629_v33, %v1543_v18 }
 0x2d8   :  { %v2336_v41 = vpop.f32.mrf.mxu1 }
 0x2d9   :  { %2351 = vrsqrt.f32 %v1630_v34  ;;  %vm1642_vm4 = vcmp.eq.f32.partialorder %v1630_v34, inf  ;;  %v1645_v11 = vand.u32 2147483648, %v1630_v34  ;;  %vm1644_vm5 = vcmp.eq.f32.partialorder %v1630_v34, 0.0 }
 0x2e6   :  { %v2352_v19 = vpop.eup %2351 }
 0x2e7   :  { %v1641_v10 = vmul.f32 %v2352_v19, %v1630_v34 }
 0x2e9   :  { %v1643_v45 = vsel %vm1642_vm4, %v1630_v34, %v1641_v10 }
 0x2ea   :  { %v1646_v54 = vsel %vm1644_vm5, %v1645_v11, %v1643_v45 }
 0x2eb   :  { %v1650_v32 = vmul.f32 0.5, %v1646_v54  ;;  %1648 = vst [vmem:[#allocation6] sm:$0x1] %v1646_v54 }
 0x2ed   :  { %v1651_v1 = vsub.f32 %v1649_v16, %v1650_v32 }
 0x2ef   :  { %v1652_v59 = vmax.f32 %v1651_v1, 0.0 }
 0x2f1   :  { %v1659_v17 = vsel %vm1658_vm6, %v1652_v59, 0.0 }
 0x2f2   :  { %v1661_v58 = vsel %vm1660_vm7, %v1659_v17, 0.0 }
 0x2f3   :  { %1662 = vadd.xlane.f32.xlu0 %v1661_v58 }
 0x2f4   :  { %2388 = shalt.err (!%p2385_p9)
}
 0x2f5   :  { %1684 = dma.vmem_to_hbm [thread:$0]  %s1682_s22, 16, %s3343_s2, [#allocation7]  }
 0x2f6   :  { %s2397_s29 = scalar_lea.vmem %s1672_s24, 16  ;;  %s2401_s30 = scalar_lea.vmem %s1672_s24, 32 }
 0x2f7   :  { %p2398_p10 = scmp.ne.s32.totalorder %s1672_s24, %s2397_s29  ;;  %p2402_p11 = scmp.lt.s32.totalorder %s1672_s24, %s1672_s24 }
 0x2f8   :  { %p2403_p12 = scmp.lt.s32.totalorder %s2401_s30, %s2397_s29 }
 0x2fa   :  { %p2404_p13 = por %p2403_p12, %p2402_p11 }
 0x2fc   :  { %p2405_p0 = pnand %p2404_p13, %p2398_p10 }
 0x2fe   :  { %2408 = shalt.err (!%p2405_p0)
}
 0x2ff   :  { %1674 = dma.vmem_to_hbm [thread:$0]  %s1672_s24, 16, %s3342_s1, [#allocation4]  }
 0x300   :  { %s2454_s6 = smov [#allocation8]  }
 0x301   :  { %s1691_s7 = sshll.u32 %s2454_s6, 4  ;;  %s1692_s7 = int_to_ptr.vmem [resolvable:$true] %s1691_s7 }
 0x302   :  { %s2417_s8 = scalar_lea.vmem %s1692_s7, 16  ;;  %s2421_s2 = scalar_lea.vmem %s1692_s7, 32 }
 0x303   :  { %p2418_p1 = scmp.ne.s32.totalorder %s1692_s7, %s2417_s8  ;;  %p2422_p2 = scmp.lt.s32.totalorder %s1692_s7, %s1692_s7 }
 0x304   :  { %p2423_p3 = scmp.lt.s32.totalorder %s2421_s2, %s2417_s8 }
 0x306   :  { %p2424_p4 = por %p2423_p3, %p2422_p2 }
 0x308   :  { %p2425_p5 = pnand %p2424_p4, %p2418_p1 }
 0x37c   :  { %v1663_v35 = vpop.xlane.xlu0 %1662 }
 0x37d   :  { %1664 = vst [vmem:[#allocation8] sm:$0x1] %v1663_v35 }
 0x37e   :  { %2428 = shalt.err (!%p2425_p5)
}
 0x37f   :  { %1694 = dma.vmem_to_hbm [thread:$0]  %s1692_s7, 16, %s3344_s3, [#allocation7]  }
 0x380   :  { %2439 = dma.done.wait [#allocation4], 16  }
 0x381   :  { %2440 = vsyncadd [#allocation4], 4294967280 }
 0x382   :  { %2441 = dma.done.wait [#allocation7], 32  }
 0x383   :  { %2442 = vsyncadd [#allocation7], 4294967264 }
 0x384   :  { %1704 = vsyncpa [#allocation3], 1 }
 0x385   :  { %1705 = vsyncpa [#allocation4], 1 }
 0x386   :  { %1706 = vsyncpa [#allocation7], 1 }

</bundles_post_ra>
